<compile_context>
chip_gen: v5e
topology: v5e:2x2
jax: 0.10.0
libtpu: 0.0.40
codegen_flags: <defaults>
</compile_context>

<pallas_src>
import functools

import jax
import jax.numpy as jnp
from jax import lax
from jax.experimental import pallas as pl
from jax.experimental.pallas import tpu as pltpu

EPS = 1e-5


def _banded_conv3x3_weights(w_hwio, width):
    """HWIO (3, 3, Cin, Cout) -> (3, width*Cin, width*Cout) banded row-tap matrices.

    Band[ky][xi*Cin + ci, x*Cout + co] = w[ky, (xi - x) + 1, ci, co] when
    |xi - x| <= 1, else 0.  Multiplying a lane-dense activation slab
    (N*H, width*Cin) by Band[ky] applies all three horizontal taps of kernel
    row ky in one matmul; horizontal zero padding is built into the truncated
    band, so the kernel never shifts or masks along the lane axis.
    """
    kh, kw, cin, cout = w_hwio.shape
    rows = []
    for ky in range(kh):
        m = jnp.zeros((width * cin, width * cout), jnp.float32)
        for kx in range(kw):
            ox = kx - (kw // 2)
            # shift_eye[xi, x] = 1  iff  xi == x + ox   (truncated at the borders)
            shift_eye = jnp.eye(width, k=-ox, dtype=jnp.float32)
            m = m + jnp.kron(shift_eye, w_hwio[ky, kx].astype(jnp.float32))
        rows.append(m)
    return jnp.stack(rows, axis=0).astype(jnp.bfloat16)


def _conv3x3_rows(xb, w_ref, not_top, not_bot):
    """3x3 / stride-1 / pad-1 conv on a lane-dense (N*H, W*Cin) bf16 slab.

    Per-row-tap accumulation: 3 bf16 matmuls into an f32 accumulator (no 9x
    im2col slab).  Vertical taps are one-row sublane shifts with hoisted
    image-boundary masks; the masked filler rows are always zeroed so their
    contents do not matter.
    """
    rows = xb.shape[0]
    zero = jnp.zeros_like(xb)

    # ky = 1 (centre row), no shift needed.
    acc = jnp.dot(xb, w_ref[1], preferred_element_type=jnp.float32)

    # ky = 0: output row y reads input row y-1; rows with y == 0 read zero pad.
    x_up = jnp.concatenate([xb[:1], xb[: rows - 1]], axis=0)      # row r <- row r-1
    x_up = jnp.where(not_top, x_up, zero)
    acc = acc + jnp.dot(x_up, w_ref[0], preferred_element_type=jnp.float32)

    # ky = 2: output row y reads input row y+1; rows with y == H-1 read zero pad.
    x_dn = jnp.concatenate([xb[1:], xb[rows - 1:]], axis=0)       # row r <- row r+1
    x_dn = jnp.where(not_bot, x_dn, zero)
    acc = acc + jnp.dot(x_dn, w_ref[2], preferred_element_type=jnp.float32)
    return acc


def _bn_train(h, pool_ref, g_ref, b_ref, inv_cnt):
    """Training-mode BatchNorm on a lane-dense (N*H, W*C) f32 slab.

    Channel of lane l is l % C.  Single-pass batch stats: column sums and
    sum-of-squares, pooled within channel groups by one matmul against the 0/1
    channel-pooling matrix, then biased var = E[x^2] - E[x]^2 (matches
    torch.nn.BatchNorm2d in training mode).
    """
    s = jnp.sum(h, axis=0, keepdims=True)                         # (1, L)
    ss = jnp.sum(h * h, axis=0, keepdims=True)                    # (1, L)
    mean = jnp.dot(s, pool_ref[...], preferred_element_type=jnp.float32) * inv_cnt
    ex2 = jnp.dot(ss, pool_ref[...], preferred_element_type=jnp.float32) * inv_cnt
    var = ex2 - mean * mean
    return (h - mean) * lax.rsqrt(var + EPS) * g_ref[...] + b_ref[...]


def _basic_block_kernel(x_ref, w1_ref, w2_ref, pool_ref,
                        g1_ref, b1_ref, g2_ref, b2_ref, o_ref, *, img_h, cnt):
    """Whole BasicBlock, lane-dense layout, single invocation (toy shapes fit VMEM).

    x_ref   : (N*H, W*Cin)       bf16  input slab (also the identity branch)
    w1_ref  : (3, W*Cin,  W*Cout) bf16  conv1 banded row-tap weights
    w2_ref  : (3, W*Cout, W*Cout) bf16  conv2 banded row-tap weights
    pool_ref: (W*Cout, W*Cout)    f32   0/1 channel-pooling matrix for BN stats
    g*/b*   : (1, W*Cout)         f32   per-lane BN gamma / beta
    o_ref   : (N*H, W*Cout)       f32   output slab (dense store)
    """
    rows, lanes = x_ref.shape
    x = x_ref[...]                                                # bf16, read once

    # Hoisted vertical-boundary masks (y == 0 / y == H-1 rows of each image).
    y = lax.broadcasted_iota(jnp.int32, (rows, lanes), 0) % img_h
    not_top = y != 0
    not_bot = y != (img_h - 1)

    inv_cnt = 1.0 / cnt

    # ---- conv1 -> bn1 (batch stats) -> relu ----
    h1 = _conv3x3_rows(x, w1_ref, not_top, not_bot)               # (rows, L) f32
    a1 = jnp.maximum(_bn_train(h1, pool_ref, g1_ref, b1_ref, inv_cnt), 0.0)

    # ---- conv2 -> bn2 ----
    h2 = _conv3x3_rows(a1.astype(jnp.bfloat16), w2_ref, not_top, not_bot)
    out = _bn_train(h2, pool_ref, g2_ref, b2_ref, inv_cnt)

    # ---- residual add (stride=1, downsample=None, Cin==Cout) + relu ----
    o_ref[...] = jnp.maximum(out + x.astype(jnp.float32), 0.0)


@jax.jit
def basic_block_forward(x_nchw, w1_hwio, g1, b1, w2_hwio, g2, b2):
    """Runs the Pallas BasicBlock.  x_nchw: (N, C, H, W) float32 (PyTorch layout)."""
    n, c, h, w = x_nchw.shape
    cout = w1_hwio.shape[-1]
    assert c == cout, "stride=1 / downsample=None BasicBlock needs inplanes == planes"

    # Interface-only layout change: NCHW -> lane-dense (N*H, W*C) slab, bf16 once.
    x_slab = (jnp.transpose(x_nchw, (0, 2, 3, 1))                 # NCHW -> NHWC
              .reshape(n * h, w * c)
              .astype(jnp.bfloat16))

    w1b = _banded_conv3x3_weights(w1_hwio, w)                     # (3, W*C, W*Cout) bf16
    w2b = _banded_conv3x3_weights(w2_hwio, w)                     # (3, W*Cout, W*Cout) bf16
    pool = jnp.kron(jnp.ones((w, w), jnp.float32),
                    jnp.eye(cout, dtype=jnp.float32))             # (W*Cout, W*Cout)

    def per_lane(v):                                              # (C,) -> (1, W*C)
        return jnp.tile(v.astype(jnp.float32), w).reshape(1, w * cout)

    kernel = functools.partial(_basic_block_kernel, img_h=h, cnt=float(n * h * w))
    vmem = pl.BlockSpec(memory_space=pltpu.MemorySpace.VMEM)

    out_slab = pl.pallas_call(
        kernel,
        out_shape=jax.ShapeDtypeStruct((n * h, w * cout), jnp.float32),
        in_specs=[vmem] * 8,
        out_specs=vmem,
    )(x_slab, w1b, w2b, pool, per_lane(g1), per_lane(b1), per_lane(g2), per_lane(b2))

    return jnp.transpose(out_slab.reshape(n, h, w, cout), (0, 3, 1, 2))   # -> NCHW


def _reference_forward(x, w1_oihw, g1, b1, w2_oihw, g2, b2):
    """Pure-JAX NCHW f32 reference with the same training-mode BN semantics."""
    def conv(z, wgt):
        return lax.conv_general_dilated(
            z, wgt, (1, 1), ((1, 1), (1, 1)),
            dimension_numbers=("NCHW", "OIHW", "NCHW"))

    def bn(z, g, b):
        mean = z.mean(axis=(0, 2, 3), keepdims=True)
        var = ((z - mean) ** 2).mean(axis=(0, 2, 3), keepdims=True)
        return (z - mean) / jnp.sqrt(var + EPS) * g.reshape(1, -1, 1, 1) \
            + b.reshape(1, -1, 1, 1)

    out = jnp.maximum(bn(conv(x, w1_oihw), g1, b1), 0.0)
    out = bn(conv(out, w2_oihw), g2, b2)
    return jnp.maximum(out + x, 0.0)


if __name__ == "__main__":
    key = jax.random.PRNGKey(0)
    k_x, k_w1, k_w2 = jax.random.split(key, 3)

    N, C, H, W = 2, 4, 16, 16        # inplanes == planes (stride=1, no downsample)
    x = jax.random.normal(k_x, (N, C, H, W), jnp.float32)

    # Deterministic parameter init (shapes from BasicBlock.__init__), HWIO weights.
    w1_hwio = 0.1 * jax.random.normal(k_w1, (3, 3, C, C), jnp.float32)
    w2_hwio = 0.1 * jax.random.normal(k_w2, (3, 3, C, C), jnp.float32)
    g1 = 1.0 + 0.05 * jnp.arange(C, dtype=jnp.float32)
    b1 = 0.02 * jnp.arange(C, dtype=jnp.float32)
    g2 = 1.0 - 0.03 * jnp.arange(C, dtype=jnp.float32)
    b2 = -0.01 * jnp.arange(C, dtype=jnp.float32)

    out = basic_block_forward(x, w1_hwio, g1, b1, w2_hwio, g2, b2)
    out = jax.block_until_ready(out)

    # Cross-check against a pure-JAX f32 NCHW/OIHW reference.  The kernel uses
    # bf16 MXU operands (per perf guidance) with f32 accumulation and f32 BN
    # math, so allow a few-1e-2 deviation; real logic bugs produce O(1) errors.
    w1_oihw = jnp.transpose(w1_hwio, (3, 2, 0, 1))
    w2_oihw = jnp.transpose(w2_hwio, (3, 2, 0, 1))
    ref = _reference_forward(x, w1_oihw, g1, b1, w2_oihw, g2, b2)
    assert out.shape == (N, C, H, W)
    assert jnp.allclose(out, ref, atol=3e-2, rtol=3e-2), "mismatch vs reference"

    print("KERNEL_OK")
</pallas_src>

<mosaic_0001>
module attributes {stable_mosaic.version = 11 : i64} {
  func.func @_basic_block_kernel(%arg0: memref<32x64xbf16, #tpu.memory_space<vmem>>, %arg1: memref<3x64x64xbf16, #tpu.memory_space<vmem>>, %arg2: memref<3x64x64xbf16, #tpu.memory_space<vmem>>, %arg3: memref<64x64xf32, #tpu.memory_space<vmem>>, %arg4: memref<1x64xf32, #tpu.memory_space<vmem>>, %arg5: memref<1x64xf32, #tpu.memory_space<vmem>>, %arg6: memref<1x64xf32, #tpu.memory_space<vmem>>, %arg7: memref<1x64xf32, #tpu.memory_space<vmem>>, %arg8: memref<32x64xf32, #tpu.memory_space<vmem>>) attributes {dimension_semantics = [], scalar_prefetch = 0 : i64, scratch_operands = 0 : i64, tpu.core_type = #tpu.core_type<tc>} {
    %c0 = arith.constant 0 : index
    %c0_0 = arith.constant 0 : index
    %0 = vector.load %arg0[%c0, %c0_0] : memref<32x64xbf16, #tpu.memory_space<vmem>>, vector<32x64xbf16>
    %1 = tpu.iota {dimensions = array<i32: 0>} : vector<32x64xi32>
    %c16_i32 = arith.constant 16 : i32
    %c0_i32 = arith.constant 0 : i32
    %2 = arith.cmpi eq, %c16_i32, %c0_i32 : i32
    %c1_i32 = arith.constant 1 : i32
    %3 = arith.select %2, %c1_i32, %c16_i32 : i32
    %4 = vector.broadcast %3 : i32 to vector<32x64xi32>
    %5 = arith.remsi %1, %4 : vector<32x64xi32>
    %c0_i32_1 = arith.constant 0 : i32
    %6 = vector.broadcast %c0_i32_1 : i32 to vector<32x64xi32>
    %7 = arith.cmpi ne, %5, %6 : vector<32x64xi32>
    %c0_i32_2 = arith.constant 0 : i32
    %8 = vector.broadcast %c0_i32_2 : i32 to vector<32x64xi32>
    %9 = arith.cmpi slt, %5, %8 : vector<32x64xi32>
    %c0_i32_3 = arith.constant 0 : i32
    %10 = arith.cmpi slt, %3, %c0_i32_3 : i32
    %11 = vector.broadcast %10 : i1 to vector<32x64xi1>
    %12 = vector.broadcast %11 : vector<32x64xi1> to vector<32x64xi1>
    %13 = arith.xori %9, %12 : vector<32x64xi1>
    %14 = arith.andi %13, %7 : vector<32x64xi1>
    %15 = vector.broadcast %3 : i32 to vector<32x64xi32>
    %16 = arith.addi %5, %15 : vector<32x64xi32>
    %17 = arith.select %14, %16, %5 : vector<32x64xi1>, vector<32x64xi32>
    %c0_i32_4 = arith.constant 0 : i32
    %18 = vector.broadcast %c0_i32_4 : i32 to vector<32x64xi32>
    %19 = arith.cmpi ne, %17, %18 : vector<32x64xi32>
    %c15_i32 = arith.constant 15 : i32
    %20 = vector.broadcast %c15_i32 : i32 to vector<32x64xi32>
    %21 = arith.cmpi ne, %17, %20 : vector<32x64xi32>
    %cst = arith.constant 0.000000e+00 : bf16
    %22 = vector.broadcast %cst : bf16 to vector<32x64xbf16>
    %c1 = arith.constant 1 : index
    %c0_5 = arith.constant 0 : index
    %c0_6 = arith.constant 0 : index
    %23 = vector.load %arg1[%c1, %c0_5, %c0_6] : memref<3x64x64xbf16, #tpu.memory_space<vmem>>, vector<1x64x64xbf16>
    %24 = vector.shape_cast %23 : vector<1x64x64xbf16> to vector<64x64xbf16>
    %cst_7 = arith.constant dense<0.000000e+00> : vector<32x64xf32>
    %25 = tpu.matmul %0, %24, %cst_7 {dimension_numbers = #tpu.dot_dimension_numbers<[1], [0], [0], [1], [0, 0, 1, 1], [], []>} : vector<32x64xbf16>, vector<64x64xbf16>, vector<32x64xf32> -> vector<32x64xf32>
    %26 = vector.extract_strided_slice %0 {offsets = [0, 0], sizes = [1, 64], strides = [1, 1]} : vector<32x64xbf16> to vector<1x64xbf16>
    %27 = vector.extract_strided_slice %0 {offsets = [0, 0], sizes = [31, 64], strides = [1, 1]} : vector<32x64xbf16> to vector<31x64xbf16>
    %28 = tpu.concatenate %26, %27 in 0 : vector<1x64xbf16>, vector<31x64xbf16> -> vector<32x64xbf16>
    %29 = arith.select %19, %28, %22 : vector<32x64xi1>, vector<32x64xbf16>
    %c0_8 = arith.constant 0 : index
    %c0_9 = arith.constant 0 : index
    %c0_10 = arith.constant 0 : index
    %30 = vector.load %arg1[%c0_8, %c0_9, %c0_10] : memref<3x64x64xbf16, #tpu.memory_space<vmem>>, vector<1x64x64xbf16>
    %31 = vector.shape_cast %30 : vector<1x64x64xbf16> to vector<64x64xbf16>
    %cst_11 = arith.constant dense<0.000000e+00> : vector<32x64xf32>
    %32 = tpu.matmul %29, %31, %cst_11 {dimension_numbers = #tpu.dot_dimension_numbers<[1], [0], [0], [1], [0, 0, 1, 1], [], []>} : vector<32x64xbf16>, vector<64x64xbf16>, vector<32x64xf32> -> vector<32x64xf32>
    %33 = arith.addf %25, %32 : vector<32x64xf32>
    %34 = vector.extract_strided_slice %0 {offsets = [1, 0], sizes = [31, 64], strides = [1, 1]} : vector<32x64xbf16> to vector<31x64xbf16>
    %35 = vector.extract_strided_slice %0 {offsets = [31, 0], sizes = [1, 64], strides = [1, 1]} : vector<32x64xbf16> to vector<1x64xbf16>
    %36 = tpu.concatenate %34, %35 in 0 : vector<31x64xbf16>, vector<1x64xbf16> -> vector<32x64xbf16>
    %37 = arith.select %21, %36, %22 : vector<32x64xi1>, vector<32x64xbf16>
    %c2 = arith.constant 2 : index
    %c0_12 = arith.constant 0 : index
    %c0_13 = arith.constant 0 : index
    %38 = vector.load %arg1[%c2, %c0_12, %c0_13] : memref<3x64x64xbf16, #tpu.memory_space<vmem>>, vector<1x64x64xbf16>
    %39 = vector.shape_cast %38 : vector<1x64x64xbf16> to vector<64x64xbf16>
    %cst_14 = arith.constant dense<0.000000e+00> : vector<32x64xf32>
    %40 = tpu.matmul %37, %39, %cst_14 {dimension_numbers = #tpu.dot_dimension_numbers<[1], [0], [0], [1], [0, 0, 1, 1], [], []>} : vector<32x64xbf16>, vector<64x64xbf16>, vector<32x64xf32> -> vector<32x64xf32>
    %41 = arith.addf %33, %40 : vector<32x64xf32>
    %cst_15 = arith.constant dense<0.000000e+00> : vector<64xf32>
    %42 = vector.multi_reduction <add>, %41, %cst_15 [0] : vector<32x64xf32> to vector<64xf32>
    %43 = vector.shape_cast %42 : vector<64xf32> to vector<1x64xf32>
    %44 = arith.mulf %41, %41 : vector<32x64xf32>
    %cst_16 = arith.constant dense<0.000000e+00> : vector<64xf32>
    %45 = vector.multi_reduction <add>, %44, %cst_16 [0] : vector<32x64xf32> to vector<64xf32>
    %46 = vector.shape_cast %45 : vector<64xf32> to vector<1x64xf32>
    %c0_17 = arith.constant 0 : index
    %c0_18 = arith.constant 0 : index
    %47 = vector.load %arg3[%c0_17, %c0_18] : memref<64x64xf32, #tpu.memory_space<vmem>>, vector<64x64xf32>
    %cst_19 = arith.constant dense<0.000000e+00> : vector<1x64xf32>
    %48 = tpu.matmul %43, %47, %cst_19 {dimension_numbers = #tpu.dot_dimension_numbers<[1], [0], [0], [1], [0, 0, 1, 1], [], []>} : vector<1x64xf32>, vector<64x64xf32>, vector<1x64xf32> -> vector<1x64xf32>
    %cst_20 = arith.constant 0.001953125 : f32
    %49 = vector.broadcast %cst_20 : f32 to vector<1x64xf32>
    %50 = arith.mulf %48, %49 : vector<1x64xf32>
    %c0_21 = arith.constant 0 : index
    %c0_22 = arith.constant 0 : index
    %51 = vector.load %arg3[%c0_21, %c0_22] : memref<64x64xf32, #tpu.memory_space<vmem>>, vector<64x64xf32>
    %cst_23 = arith.constant dense<0.000000e+00> : vector<1x64xf32>
    %52 = tpu.matmul %46, %51, %cst_23 {dimension_numbers = #tpu.dot_dimension_numbers<[1], [0], [0], [1], [0, 0, 1, 1], [], []>} : vector<1x64xf32>, vector<64x64xf32>, vector<1x64xf32> -> vector<1x64xf32>
    %cst_24 = arith.constant 0.001953125 : f32
    %53 = vector.broadcast %cst_24 : f32 to vector<1x64xf32>
    %54 = arith.mulf %52, %53 : vector<1x64xf32>
    %55 = arith.mulf %50, %50 : vector<1x64xf32>
    %56 = arith.subf %54, %55 : vector<1x64xf32>
    %57 = vector.broadcast %50 : vector<1x64xf32> to vector<32x64xf32>
    %58 = arith.subf %41, %57 : vector<32x64xf32>
    %cst_25 = arith.constant 9.99999974E-6 : f32
    %59 = vector.broadcast %cst_25 : f32 to vector<1x64xf32>
    %60 = arith.addf %56, %59 : vector<1x64xf32>
    %61 = math.rsqrt %60 : vector<1x64xf32>
    %62 = vector.broadcast %61 : vector<1x64xf32> to vector<32x64xf32>
    %63 = arith.mulf %58, %62 : vector<32x64xf32>
    %c0_26 = arith.constant 0 : index
    %c0_27 = arith.constant 0 : index
    %64 = vector.load %arg4[%c0_26, %c0_27] : memref<1x64xf32, #tpu.memory_space<vmem>>, vector<1x64xf32>
    %65 = vector.broadcast %64 : vector<1x64xf32> to vector<32x64xf32>
    %66 = arith.mulf %63, %65 : vector<32x64xf32>
    %c0_28 = arith.constant 0 : index
    %c0_29 = arith.constant 0 : index
    %67 = vector.load %arg5[%c0_28, %c0_29] : memref<1x64xf32, #tpu.memory_space<vmem>>, vector<1x64xf32>
    %68 = vector.broadcast %67 : vector<1x64xf32> to vector<32x64xf32>
    %69 = arith.addf %66, %68 : vector<32x64xf32>
    %cst_30 = arith.constant 0.000000e+00 : f32
    %70 = vector.broadcast %cst_30 : f32 to vector<32x64xf32>
    %71 = arith.maximumf %69, %70 : vector<32x64xf32>
    %72 = arith.truncf %71 : vector<32x64xf32> to vector<32x64xbf16>
    %cst_31 = arith.constant 0.000000e+00 : bf16
    %73 = vector.broadcast %cst_31 : bf16 to vector<32x64xbf16>
    %c1_32 = arith.constant 1 : index
    %c0_33 = arith.constant 0 : index
    %c0_34 = arith.constant 0 : index
    %74 = vector.load %arg2[%c1_32, %c0_33, %c0_34] : memref<3x64x64xbf16, #tpu.memory_space<vmem>>, vector<1x64x64xbf16>
    %75 = vector.shape_cast %74 : vector<1x64x64xbf16> to vector<64x64xbf16>
    %cst_35 = arith.constant dense<0.000000e+00> : vector<32x64xf32>
    %76 = tpu.matmul %72, %75, %cst_35 {dimension_numbers = #tpu.dot_dimension_numbers<[1], [0], [0], [1], [0, 0, 1, 1], [], []>} : vector<32x64xbf16>, vector<64x64xbf16>, vector<32x64xf32> -> vector<32x64xf32>
    %77 = vector.extract_strided_slice %72 {offsets = [0, 0], sizes = [1, 64], strides = [1, 1]} : vector<32x64xbf16> to vector<1x64xbf16>
    %78 = vector.extract_strided_slice %72 {offsets = [0, 0], sizes = [31, 64], strides = [1, 1]} : vector<32x64xbf16> to vector<31x64xbf16>
    %79 = tpu.concatenate %77, %78 in 0 : vector<1x64xbf16>, vector<31x64xbf16> -> vector<32x64xbf16>
    %80 = arith.select %19, %79, %73 : vector<32x64xi1>, vector<32x64xbf16>
    %c0_36 = arith.constant 0 : index
    %c0_37 = arith.constant 0 : index
    %c0_38 = arith.constant 0 : index
    %81 = vector.load %arg2[%c0_36, %c0_37, %c0_38] : memref<3x64x64xbf16, #tpu.memory_space<vmem>>, vector<1x64x64xbf16>
    %82 = vector.shape_cast %81 : vector<1x64x64xbf16> to vector<64x64xbf16>
    %cst_39 = arith.constant dense<0.000000e+00> : vector<32x64xf32>
    %83 = tpu.matmul %80, %82, %cst_39 {dimension_numbers = #tpu.dot_dimension_numbers<[1], [0], [0], [1], [0, 0, 1, 1], [], []>} : vector<32x64xbf16>, vector<64x64xbf16>, vector<32x64xf32> -> vector<32x64xf32>
    %84 = arith.addf %76, %83 : vector<32x64xf32>
    %85 = vector.extract_strided_slice %72 {offsets = [1, 0], sizes = [31, 64], strides = [1, 1]} : vector<32x64xbf16> to vector<31x64xbf16>
    %86 = vector.extract_strided_slice %72 {offsets = [31, 0], sizes = [1, 64], strides = [1, 1]} : vector<32x64xbf16> to vector<1x64xbf16>
    %87 = tpu.concatenate %85, %86 in 0 : vector<31x64xbf16>, vector<1x64xbf16> -> vector<32x64xbf16>
    %88 = arith.select %21, %87, %73 : vector<32x64xi1>, vector<32x64xbf16>
    %c2_40 = arith.constant 2 : index
    %c0_41 = arith.constant 0 : index
    %c0_42 = arith.constant 0 : index
    %89 = vector.load %arg2[%c2_40, %c0_41, %c0_42] : memref<3x64x64xbf16, #tpu.memory_space<vmem>>, vector<1x64x64xbf16>
    %90 = vector.shape_cast %89 : vector<1x64x64xbf16> to vector<64x64xbf16>
    %cst_43 = arith.constant dense<0.000000e+00> : vector<32x64xf32>
    %91 = tpu.matmul %88, %90, %cst_43 {dimension_numbers = #tpu.dot_dimension_numbers<[1], [0], [0], [1], [0, 0, 1, 1], [], []>} : vector<32x64xbf16>, vector<64x64xbf16>, vector<32x64xf32> -> vector<32x64xf32>
    %92 = arith.addf %84, %91 : vector<32x64xf32>
    %cst_44 = arith.constant dense<0.000000e+00> : vector<64xf32>
    %93 = vector.multi_reduction <add>, %92, %cst_44 [0] : vector<32x64xf32> to vector<64xf32>
    %94 = vector.shape_cast %93 : vector<64xf32> to vector<1x64xf32>
    %95 = arith.mulf %92, %92 : vector<32x64xf32>
    %cst_45 = arith.constant dense<0.000000e+00> : vector<64xf32>
    %96 = vector.multi_reduction <add>, %95, %cst_45 [0] : vector<32x64xf32> to vector<64xf32>
    %97 = vector.shape_cast %96 : vector<64xf32> to vector<1x64xf32>
    %c0_46 = arith.constant 0 : index
    %c0_47 = arith.constant 0 : index
    %98 = vector.load %arg3[%c0_46, %c0_47] : memref<64x64xf32, #tpu.memory_space<vmem>>, vector<64x64xf32>
    %cst_48 = arith.constant dense<0.000000e+00> : vector<1x64xf32>
    %99 = tpu.matmul %94, %98, %cst_48 {dimension_numbers = #tpu.dot_dimension_numbers<[1], [0], [0], [1], [0, 0, 1, 1], [], []>} : vector<1x64xf32>, vector<64x64xf32>, vector<1x64xf32> -> vector<1x64xf32>
    %cst_49 = arith.constant 0.001953125 : f32
    %100 = vector.broadcast %cst_49 : f32 to vector<1x64xf32>
    %101 = arith.mulf %99, %100 : vector<1x64xf32>
    %c0_50 = arith.constant 0 : index
    %c0_51 = arith.constant 0 : index
    %102 = vector.load %arg3[%c0_50, %c0_51] : memref<64x64xf32, #tpu.memory_space<vmem>>, vector<64x64xf32>
    %cst_52 = arith.constant dense<0.000000e+00> : vector<1x64xf32>
    %103 = tpu.matmul %97, %102, %cst_52 {dimension_numbers = #tpu.dot_dimension_numbers<[1], [0], [0], [1], [0, 0, 1, 1], [], []>} : vector<1x64xf32>, vector<64x64xf32>, vector<1x64xf32> -> vector<1x64xf32>
    %cst_53 = arith.constant 0.001953125 : f32
    %104 = vector.broadcast %cst_53 : f32 to vector<1x64xf32>
    %105 = arith.mulf %103, %104 : vector<1x64xf32>
    %106 = arith.mulf %101, %101 : vector<1x64xf32>
    %107 = arith.subf %105, %106 : vector<1x64xf32>
    %108 = vector.broadcast %101 : vector<1x64xf32> to vector<32x64xf32>
    %109 = arith.subf %92, %108 : vector<32x64xf32>
    %cst_54 = arith.constant 9.99999974E-6 : f32
    %110 = vector.broadcast %cst_54 : f32 to vector<1x64xf32>
    %111 = arith.addf %107, %110 : vector<1x64xf32>
    %112 = math.rsqrt %111 : vector<1x64xf32>
    %113 = vector.broadcast %112 : vector<1x64xf32> to vector<32x64xf32>
    %114 = arith.mulf %109, %113 : vector<32x64xf32>
    %c0_55 = arith.constant 0 : index
    %c0_56 = arith.constant 0 : index
    %115 = vector.load %arg6[%c0_55, %c0_56] : memref<1x64xf32, #tpu.memory_space<vmem>>, vector<1x64xf32>
    %116 = vector.broadcast %115 : vector<1x64xf32> to vector<32x64xf32>
    %117 = arith.mulf %114, %116 : vector<32x64xf32>
    %c0_57 = arith.constant 0 : index
    %c0_58 = arith.constant 0 : index
    %118 = vector.load %arg7[%c0_57, %c0_58] : memref<1x64xf32, #tpu.memory_space<vmem>>, vector<1x64xf32>
    %119 = vector.broadcast %118 : vector<1x64xf32> to vector<32x64xf32>
    %120 = arith.addf %117, %119 : vector<32x64xf32>
    %121 = arith.extf %0 : vector<32x64xbf16> to vector<32x64xf32>
    %122 = arith.addf %120, %121 : vector<32x64xf32>
    %cst_59 = arith.constant 0.000000e+00 : f32
    %123 = vector.broadcast %cst_59 : f32 to vector<32x64xf32>
    %124 = arith.maximumf %122, %123 : vector<32x64xf32>
    %c0_60 = arith.constant 0 : index
    %c0_61 = arith.constant 0 : index
    %125 = vector.load %arg8[%c0_60, %c0_61] : memref<32x64xf32, #tpu.memory_space<vmem>>, vector<32x64xf32>
    tpu.vector_store %arg8[%c0_60, %c0_61], %124 {strides = array<i32>} : memref<32x64xf32, #tpu.memory_space<vmem>>, vector<32x64xf32>,
    return
  }
}

</mosaic_0001>

<bundles_post_ra>
// kernel: tile.23
= control target key start
LH: loop header
LB: loop body
LE: loop exit
PB: predicated region body
PF: predicated region fallthrough
CT: control target
= control target key end

     0   :  { %s28_s0 = inlined_call_operand.vmem [shape: f32[4], index: 0, kind: input, shape index: {}]   ;;  %s29_s1 = inlined_call_operand.vmem [shape: f32[16,4], index: 1, kind: output, shape index: {}]  }
   0x1   :  { %v4_v0 = vld [vmem:[%s28_s0] ss:$0 sm:$0xff] }
   0x2   :  { %5 = vst [vmem:[%s29_s1] sm:$0xff] %v4_v0 }
   0x3   :  { %8 = vst [vmem:[%s29_s1 + $0x8] sm:$0xff] %v4_v0 }

// kernel: tile.24
= control target key start
LH: loop header
LB: loop body
LE: loop exit
PB: predicated region body
PF: predicated region fallthrough
CT: control target
= control target key end

     0   :  { %s131_s10 = smov 60   ;;  %s132_s11 = smov 52   ;;  %vm3_vm0 = vcmask 31744   ;;  %vm9_vm1 = vcmask 523744   ;;  %vm15_vm2 = vcmask 490944   ;;  %vm21_vm3 = vcmask 458144   ;;  %s207_s0 = inlined_call_operand.vmem [shape: f32[16,4], index: 0, kind: input, shape index: {}]   ;;  %s208_s1 = inlined_call_operand.vmem [shape: f32[1,64], index: 1, kind: output, shape index: {}]  }
   0x1   :  { %v101_v0 = vld [vmem:[%s207_s0 + $0xf] sm:$0x1]   ;;  %v103_v1 = vld [vmem:[%s207_s0 + $0xd] sm:$0x1]   ;;  %v105_v2 = vld [vmem:[%s207_s0 + $0xb] sm:$0x1]  }
   0x2   :  { %7 = vrot.lane.b32.xlu0 %v101_v0, %s131_s10  ;;  %19 = vrot.lane.b32.xlu1 %v103_v1, %s132_s11  ;;  %s133_s14 = smov 44   ;;  %v102_v3 = vld [vmem:[%s207_s0 + $0xe] sm:$0x1]   ;;  %v104_v4 = vld [vmem:[%s207_s0 + $0xc] sm:$0x1]   ;;  %s134_s19 = smov 56  }
   0x3   :  { %31 = vrot.lane.b32.xlu2 %v105_v2, %s133_s14  ;;  %s135_s20 = smov 48   ;;  %v106_v5 = vld [vmem:[%s207_s0 + $0xa] sm:$0x1]   ;;  %s136_s23 = smov 40   ;;  %v107_v6 = vld [vmem:[%s207_s0 + $0x9] sm:$0x1]  }
   0x4   :  { %v108_v7 = vld [vmem:[%s207_s0 + $0x8] sm:$0x1]   ;;  %s137_s28 = smov 36   ;;  %s138_s29 = smov 32   ;;  %v109_v8 = vld [vmem:[%s207_s0 + $0x7] sm:$0x1]  }
   0x5   :  { %s139_s3 = smov 28   ;;  %v110_v9 = vld [vmem:[%s207_s0 + $0x6] sm:$0x1]   ;;  %v111_v10 = vld [vmem:[%s207_s0 + $0x5] sm:$0x1]   ;;  %s140_s8 = smov 24  }
   0x6   :  { %s141_s9 = smov 20   ;;  %v112_v11 = vld [vmem:[%s207_s0 + $0x4] sm:$0x1]   ;;  %s142_s12 = smov 16   ;;  %v113_v12 = vld [vmem:[%s207_s0 + $0x3] sm:$0x1]  }
   0x7   :  { %v114_v13 = vld [vmem:[%s207_s0 + $0x2] sm:$0x1]   ;;  %s143_s17 = smov 12   ;;  %s144_s18 = smov 8   ;;  %v115_v14 = vld [vmem:[%s207_s0 + $0x1] sm:$0x1]  }
   0x8   :  { %s145_s21 = smov 4   ;;  %v2_v15 = vld [vmem:[%s207_s0] sm:$0x1]   ;;  %vm27_vm4 = vcmask 425344   ;;  %vm33_vm5 = vcmask 392544   ;;  %vm39_vm6 = vcmask 359744  }
   0x9   :  { %4 = vst.msk [vmem:[#allocation0] sm:$0x1] %vm3_vm0, %v2_v15   ;;  %vm45_vm7 = vcmask 326944   ;;  %vm51_vm8 = vcmask 294144   ;;  %vm57_vm9 = vcmask 261344   ;;  %vm63_vm10 = vcmask 228544  }
   0xa   :  { %13 = vrot.lane.b32.xlu0 %v102_v3, %s134_s19  ;;  %25 = vrot.lane.b32.xlu1 %v104_v4, %s135_s20  ;;  %vm69_vm11 = vcmask 195744   ;;  %vm75_vm12 = vcmask 162944   ;;  %vm81_vm13 = vcmask 130144   ;;  %vm87_vm14 = vcmask 97344  }
   0xb   :  { %37 = vrot.lane.b32.xlu2 %v106_v5, %s136_s23  ;;  %vm93_vm15 = vcmask 64544  }
  0x12   :  { %43 = vrot.lane.b32.xlu0 %v107_v6, %s137_s28  ;;  %49 = vrot.lane.b32.xlu1 %v108_v7, %s138_s29 }
  0x13   :  { %55 = vrot.lane.b32.xlu2 %v109_v8, %s139_s3 }
  0x1a   :  { %61 = vrot.lane.b32.xlu0 %v110_v9, %s140_s8  ;;  %67 = vrot.lane.b32.xlu1 %v111_v10, %s141_s9 }
  0x1b   :  { %73 = vrot.lane.b32.xlu2 %v112_v11, %s142_s12 }
  0x22   :  { %79 = vrot.lane.b32.xlu0 %v113_v12, %s143_s17  ;;  %85 = vrot.lane.b32.xlu1 %v114_v13, %s144_s18 }
  0x23   :  { %91 = vrot.lane.b32.xlu2 %v115_v14, %s145_s21 }
  0x5d   :  { %v32_v16 = vpop.permute.xlu2 %31  }
  0x65   :  { %v38_v17 = vpop.permute.xlu2 %37  }
  0x6d   :  { %v56_v18 = vpop.permute.xlu2 %55  }
  0x74   :  { %v8_v19 = vpop.permute.xlu0 %7   ;;  %v20_v20 = vpop.permute.xlu1 %19  }
  0x75   :  { %10 = vst.msk [vmem:[#allocation0] sm:$0x1] %vm9_vm1, %v8_v19   ;;  %v74_v21 = vpop.permute.xlu2 %73  }
  0x7c   :  { %v14_v22 = vpop.permute.xlu0 %13   ;;  %v26_v23 = vpop.permute.xlu1 %25  }
  0x7d   :  { %16 = vst.msk [vmem:[#allocation0] sm:$0x1] %vm15_vm2, %v14_v22   ;;  %v92_v24 = vpop.permute.xlu2 %91  }
  0x7e   :  { %22 = vst.msk [vmem:[#allocation0] sm:$0x1] %vm21_vm3, %v20_v20  }
  0x7f   :  { %28 = vst.msk [vmem:[#allocation0] sm:$0x1] %vm27_vm4, %v26_v23  }
  0x80   :  { %34 = vst.msk [vmem:[#allocation0] sm:$0x1] %vm33_vm5, %v32_v16  }
  0x81   :  { %40 = vst.msk [vmem:[#allocation0] sm:$0x1] %vm39_vm6, %v38_v17  }
  0x84   :  { %v44_v25 = vpop.permute.xlu0 %43   ;;  %v50_v26 = vpop.permute.xlu1 %49  }
  0x85   :  { %46 = vst.msk [vmem:[#allocation0] sm:$0x1] %vm45_vm7, %v44_v25  }
  0x86   :  { %52 = vst.msk [vmem:[#allocation0] sm:$0x1] %vm51_vm8, %v50_v26  }
  0x87   :  { %58 = vst.msk [vmem:[#allocation0] sm:$0x1] %vm57_vm9, %v56_v18  }
  0x8c   :  { %v62_v27 = vpop.permute.xlu0 %61   ;;  %v68_v28 = vpop.permute.xlu1 %67  }
  0x8d   :  { %64 = vst.msk [vmem:[#allocation0] sm:$0x1] %vm63_vm10, %v62_v27  }
  0x8e   :  { %70 = vst.msk [vmem:[#allocation0] sm:$0x1] %vm69_vm11, %v68_v28  }
  0x8f   :  { %76 = vst.msk [vmem:[#allocation0] sm:$0x1] %vm75_vm12, %v74_v21  }
  0x94   :  { %v80_v29 = vpop.permute.xlu0 %79   ;;  %v86_v30 = vpop.permute.xlu1 %85  }
  0x95   :  { %82 = vst.msk [vmem:[#allocation0] sm:$0x1] %vm81_vm13, %v80_v29  }
  0x96   :  { %88 = vst.msk [vmem:[#allocation0] sm:$0x1] %vm87_vm14, %v86_v30  }
  0x97   :  { %94 = vst.msk [vmem:[#allocation0] sm:$0x1] %vm93_vm15, %v92_v24  }
  0x9e   :  { %v97_v31 = vld [vmem:[#allocation0] sm:$0x1] }
  0x9f   :  { %100 = vst [vmem:[%s208_s1] sm:$0x1] %v97_v31 }

// kernel: basic_block_forward.1
= control target key start
LH: loop header
LB: loop body
LE: loop exit
PB: predicated region body
PF: predicated region fallthrough
CT: control target
= control target key end

     0   :  { %v36_v0 = vlaneseq  ;;  %vm116_vm0 = vsmask.f32 256  ;;  %vm134_vm1 = vcmask 1040384   ;;  %v1055_v13 = vmov 0   ;;  %s1481_s1 = inlined_call_operand.vmem [shape: bf16[3,64,64], index: 1, kind: input, shape index: {}]   ;;  %s1482_s0 = inlined_call_operand.vmem [shape: bf16[32,64], index: 0, kind: input, shape index: {}]   ;;  %s1483_s3 = inlined_call_operand.vmem [shape: f32[64,64], index: 3, kind: input, shape index: {}]   ;;  %s1484_s4 = inlined_call_operand.vmem [shape: f32[1,64], index: 4, kind: input, shape index: {}]   ;;  %s1485_s5 = inlined_call_operand.vmem [shape: f32[1,64], index: 5, kind: input, shape index: {}]   ;;  %s1486_s2 = inlined_call_operand.vmem [shape: bf16[3,64,64], index: 2, kind: input, shape index: {}]   ;;  %s1487_s6 = inlined_call_operand.vmem [shape: f32[1,64], index: 6, kind: input, shape index: {}]   ;;  %s1488_s7 = inlined_call_operand.vmem [shape: f32[1,64], index: 7, kind: input, shape index: {}]   ;;  %s1489_s8 = inlined_call_operand.vmem [shape: f32[32,64], index: 8, kind: output, shape index: {}]  }
   0x1   :  { %v1028_v1 = vld [vmem:[%s1481_s1 + $0x18] sm:$0xff]  ;;  %v1027_v5 = vld [vmem:[%s1481_s1 + $0x10] sm:$0xff]  ;;  %v1123_v10 = vld [vmem:[%s1482_s0] sm:$0xff]  ;;  %v1130_v14 = vunpack.c.l.b16 %v1055_v13  ;;  %vm1056_vm4 = vmmov 1   ;;  %v1162_v26 = vunpack.c.h.b16 %v1055_v13  ;;  %vm272_vm9 = vsmask.f32 7424 }
   0x2   :  { %v1024_v2 = vld [vmem:[%s1481_s1 + $0x38] sm:$0xff]  ;;  %v37_v4 = vshrl.u32 %v36_v0, 7  ;;  %210 = vmatpush.bf16.msra.mxu0 %v1028_v1  ;;  %v1023_v6 = vld [vmem:[%s1481_s1 + $0x30] sm:$0xff]  ;;  %v1135_v15 = vld [vmem:[%s1482_s0 + $0x8] sm:$0xf]  ;;  %v118_v20 = vshrl.u32 %v1123_v10, 16 }
   0x3   :  { %v1032_v3 = vld [vmem:[%s1481_s1 + $0x58] sm:$0xff]  ;;  %257 = vmatpush.bf16.msra.mxu1 %v1024_v2  ;;  %v1031_v7 = vld [vmem:[%s1481_s1 + $0x50] sm:$0xff]  ;;  %v1140_v16 = vld [vmem:[%s1482_s0 + $0xc] sm:$0xf]  ;;  %v121_v21 = vshll.u32 %v1123_v10, 16  ;;  %v112_v22 = vunpack.c.l.b16 %v1135_v15 }
   0x4   :  { %358 = vmatpush.bf16.msra.mxu2 %v1032_v3  ;;  %v45_v8 = vand.u32 15, %v37_v4  ;;  %v38_v9 = vadd.s32 8, %v37_v4  ;;  %v39_v11 = vadd.s32 16, %v37_v4  ;;  %v1026_v18 = vld [vmem:[%s1481_s1 + $0x8] sm:$0xff]  ;;  %v1155_v23 = vunpack.c.l.b16 %v1140_v16  ;;  %vm138_vm5 = vmpackc.low %vm1056_vm4, %vm1056_vm4  ;;  %v1173_v32 = vld [vmem:[%s1482_s0] sm:$0xf] }
   0x5   :  { %v1022_v19 = vld [vmem:[%s1481_s1 + $0x28] sm:$0xff]  ;;  %v40_v27 = vadd.s32 24, %v37_v4  ;;  %v1164_v28 = vrot.slane %v118_v20, 7  ;;  %v142_v29 = vsel %vm138_vm5, 65537, %v1055_v13  ;;  %vm1177_vm8 = vmand %vm134_vm1, %vm116_vm0  ;;  %v273_v35 = vrot.slane %v121_v21, 1  ;;  %v1025_v38 = vld [vmem:[%s1481_s1] sm:$0xff] }
   0x6   :  { %vm1125_vm2 = vcmp.ne.s32.totalorder %v45_v8, 0  ;;  %v52_v17 = vand.u32 15, %v38_v9  ;;  %211 = vmatpush.bf16.msra.mxu0 %v1027_v5  ;;  %v1030_v24 = vld [vmem:[%s1481_s1 + $0x48] sm:$0xff]  ;;  %v1168_v31 = vpack.c.b16 %v1155_v23, %v112_v22  ;;  %v146_v34 = vunpack.c.l.b16 %v142_v29  ;;  %v1021_v39 = vld [vmem:[%s1481_s1 + $0x20] sm:$0xff] }
   0x7   :  { %258 = vmatpush.bf16.msra.mxu1 %v1023_v6  ;;  %vm137_vm3 = vmpackc.low %vm1125_vm2, %vm1125_vm2  ;;  %v59_v37 = vand.u32 15, %v39_v11  ;;  %v123_v40 = vor.u32 %v121_v21, %v1164_v28  ;;  %v1029_v44 = vld [vmem:[%s1481_s1 + $0x40] sm:$0xff]  ;;  %v274_v46 = vor.u32 %v273_v35, %v118_v20  ;;  %vm199_vm1 = vcmask 523264   ;;  %v1266_v11 = vld [vmem:[%s1483_s3 + $0x30] sm:$0xff] }
   0x8   :  { %359 = vmatpush.bf16.msra.mxu2 %v1031_v7  ;;  %v141_v25 = vsel %vm137_vm3, 65537, %v1055_v13  ;;  %vm94_vm6 = vcmp.ne.s32.totalorder %v52_v17, 15  ;;  %v128_v42 = vshll.u32 %v1168_v31, 16  ;;  %v877_v45 = vunpack.i.l.s16 %v146_v34  ;;  %v1272_v12 = vld [vmem:[%s1483_s3 + $0x28] sm:$0xff]  ;;  %v1278_v17 = vld [vmem:[%s1483_s3 + $0x20] sm:$0xff] }
   0x9   :  { %v145_v30 = vunpack.c.l.b16 %v141_v25  ;;  %vm286_vm7 = vmpackc.low %vm94_vm6, %vm94_vm6  ;;  %vm91_vm10 = vcmp.ne.s32.totalorder %v59_v37, 0  ;;  %v136_v47 = vsel %vm1177_vm8, %v1173_v32, %v123_v40  ;;  %v66_v53 = vand.u32 15, %v40_v27  ;;  %v1296_v20 = vld [vmem:[%s1483_s3 + $0x8] sm:$0xff] }
   0xa   :  { %v290_v36 = vsel %vm286_vm7, 65537, %v1055_v13  ;;  %212 = vmatpush.bf16.msra.mxu0 %v1026_v18  ;;  %v275_v48 = vrot.slane %v128_v42, 1  ;;  %vm139_vm12 = vmpackc.low %vm91_vm10, %vm91_vm10  ;;  %vm156_vm13 = vcmp.ne.s32.totalorder %v877_v45, %v1162_v26  ;;  %vm303_vm14 = vcmp.ne.s32.totalorder %v877_v45, %v1130_v14  ;;  %v1284_v18 = vld [vmem:[%s1483_s3 + $0x18] sm:$0xff] }
   0xb   :  { %259 = vmatpush.bf16.msra.mxu1 %v1022_v19  ;;  %v876_v41 = vunpack.i.l.s16 %v145_v30  ;;  %v294_v43 = vunpack.c.l.b16 %v290_v36  ;;  %v143_v50 = vsel %vm139_vm12, 65537, %v1055_v13  ;;  %v125_v56 = vshrl.u32 %v1168_v31, 16  ;;  %v1290_v19 = vld [vmem:[%s1483_s3 + $0x10] sm:$0xff] }
   0xc   :  { %360 = vmatpush.bf16.msra.mxu2 %v1030_v24  ;;  %v276_v52 = vsel %vm272_vm9, %v274_v46, %v275_v48  ;;  %v147_v58 = vunpack.c.l.b16 %v143_v50  ;;  %vm96_vm4 = vcmp.ne.s32.totalorder %v66_v53, 15  ;;  %vm282_vm6 = vcmask 1047552   ;;  %v1302_v24 = vld [vmem:[%s1483_s3] sm:$0xff] }
   0xd   :  { %vm155_vm11 = vcmp.ne.s32.totalorder %v876_v41, %v1130_v14  ;;  %v917_v49 = vunpack.i.l.s16 %v294_v43  ;;  %vm288_vm5 = vmpackc.low %vm96_vm4, %vm96_vm4  ;;  %v127_v60 = vrot.slane %v125_v56, 7  ;;  %v277_v1 = vor.u32 %v275_v48, %v125_v56 }
   0xe   :  { %213 = vmatpush.bf16.msra.mxu0 %v1025_v38  ;;  %vm1202_vm15 = vmpackc.low %vm156_vm13, %vm155_vm11  ;;  %v292_v59 = vsel %vm288_vm5, 65537, %v1055_v13  ;;  %v878_v62 = vunpack.i.l.s16 %v147_v58  ;;  %v280_v2 = vpack.c.b16 %v1155_v23, %v1155_v23 }
   0xf   :  { %260 = vmatpush.bf16.msra.mxu1 %v1021_v39  ;;  %vm304_vm2 = vcmp.ne.s32.totalorder %v917_v49, %v1162_v26  ;;  %v165_v54 = vsel %vm1202_vm15, %v136_v47, 0  ;;  %v296_v61 = vunpack.c.l.b16 %v292_v59  ;;  %v130_v0 = vor.u32 %v128_v42, %v127_v60  ;;  %vm1228_vm10 = vmand %vm282_vm6, %vm272_vm9 }
  0x10   :  { %361 = vmatpush.bf16.msra.mxu2 %v1029_v44  ;;  %vm1212_vm3 = vmpackc.low %vm304_vm2, %vm303_vm14  ;;  %vm162_vm7 = vcmp.ne.s32.totalorder %v878_v62, %v1130_v14  ;;  %v284_v6 = vsel %vm1228_vm10, %v277_v1, %v280_v2 }
  0x11   :  { %v313_v57 = vsel %vm1212_vm3, %v276_v52, 0  ;;  %896 = vmatmul.msk.bf16.vlgmr.msra.gmra.mxu0 %vm199_vm1, %v165_v54  ;;  %v919_v63 = vunpack.i.l.s16 %v296_v61  ;;  %v131_v4 = vsel %vm116_vm0, %v1164_v28, %v130_v0  ;;  %vm1237_vm12 = vmpackc.low %vm156_vm13, %vm162_vm7 }
  0x12   :  { %914 = vmatmul.msk.bf16.vlgmr.msra.gmra.mxu1 %vm199_vm1, %v1123_v10  ;;  %v166_v8 = vsel %vm1237_vm12, %v131_v4, 0  ;;  %v1260_v10 = vld [vmem:[%s1483_s3 + $0x38] sm:$0xff] }
  0x13   :  { %944 = vmatmul.msk.bf16.vlgmr.msra.gmra.mxu2 %vm199_vm1, %v313_v57  ;;  %vm311_vm11 = vcmp.ne.s32.totalorder %v919_v63, %v1162_v26  ;;  %426 = vmatpush.msra.mxu3 %v1260_v10 }
  0x14   :  { %vm1245_vm2 = vmpackc.low %vm311_vm11, %vm303_vm14 }
  0x15   :  { %v314_v9 = vsel %vm1245_vm2, %v284_v6, 0  ;;  %427 = vmatpush.msra.mxu3 %v1266_v11 }
  0x17   :  { %428 = vmatpush.msra.mxu3 %v1272_v12 }
  0x19   :  { %429 = vmatpush.msra.mxu3 %v1278_v17 }
  0x1b   :  { %430 = vmatpush.msra.mxu3 %v1284_v18 }
  0x1d   :  { %431 = vmatpush.msra.mxu3 %v1290_v19 }
  0x1f   :  { %432 = vmatpush.msra.mxu3 %v1296_v20 }
  0x21   :  { %897 = vmatmul.msk.bf16.gmra.mxu0 %vm199_vm1, %v166_v8  ;;  %433 = vmatpush.msra.mxu3 %v1302_v24 }
  0x22   :  { %915 = vmatmul.msk.bf16.gmra.mxu1 %vm199_vm1, %v1168_v31 }
  0x23   :  { %945 = vmatmul.msk.bf16.gmra.mxu2 %vm199_vm1, %v314_v9  ;;  %450 = vmatpush.msrb.mxu3 %v1260_v10 }
  0x25   :  { %451 = vmatpush.msrb.mxu3 %v1266_v11 }
  0x27   :  { %452 = vmatpush.msrb.mxu3 %v1272_v12 }
  0x29   :  { %453 = vmatpush.msrb.mxu3 %v1278_v17 }
  0x2b   :  { %454 = vmatpush.msrb.mxu3 %v1284_v18 }
  0x2d   :  { %455 = vmatpush.msrb.mxu3 %v1290_v19 }
  0x2f   :  { %456 = vmatpush.msrb.mxu3 %v1296_v20 }
  0x31   :  { %457 = vmatpush.msrb.mxu3 %v1302_v24 }
  0x8e   :  { %v215_v13 = vpop.f32.mrf.mxu0 }
  0x8f   :  { %v262_v14 = vpop.f32.mrf.mxu1 }
  0x90   :  { %v263_v28 = vadd.f32 %v262_v14, %v215_v13 }
  0x96   :  { %v363_v21 = vpop.f32.mrf.mxu2  ;;  %v217_v22 = vpop.f32.mrf.mxu0 }
  0x97   :  { %v264_v23 = vpop.f32.mrf.mxu1  ;;  %v1314_v35 = vadd.f32 %v363_v21, %v263_v28  ;;  %v1038_v28 = vld [vmem:[%s1486_s2 + $0x8] sm:$0xff] }
  0x98   :  { %v265_v29 = vadd.f32 %v264_v23, %v217_v22  ;;  %v1036_v23 = vld [vmem:[%s1486_s2 + $0x38] sm:$0xff] }
  0x99   :  { %v390_v40 = vmul.f32 %v1314_v35, %v1314_v35  ;;  %v377_v43 = vsel %vm199_vm1, %v1314_v35, 0.0  ;;  %638 = vmatpush.bf16.msrb.mxu1 %v1036_v23 }
  0x9b   :  { %v394_v49 = vsel %vm199_vm1, %v390_v40, 0.0 }
  0x9e   :  { %v365_v25 = vpop.f32.mrf.mxu2  ;;  %v220_v26 = vpop.f32.mrf.mxu0 }
  0x9f   :  { %v267_v27 = vpop.f32.mrf.mxu1  ;;  %v1311_v31 = vadd.f32 %v365_v25, %v265_v29  ;;  %v1033_v29 = vld [vmem:[%s1486_s2 + $0x20] sm:$0xff] }
  0xa0   :  { %v268_v30 = vadd.f32 %v267_v27, %v220_v26  ;;  %v1042_v27 = vld [vmem:[%s1486_s2 + $0x48] sm:$0xff] }
  0xa1   :  { %v391_v37 = vmul.f32 %v1311_v31, %v1311_v31  ;;  %v378_v41 = vsel %vm199_vm1, %v1311_v31, 0.0 }
  0xa2   :  { %v379_v47 = vadd.f32 %v378_v41, %v377_v43 }
  0xa3   :  { %v395_v44 = vsel %vm199_vm1, %v391_v37, 0.0  ;;  %v1041_v37 = vld [vmem:[%s1486_s2 + $0x40] sm:$0xff] }
  0xa4   :  { %v396_v53 = vadd.f32 %v395_v44, %v394_v49 }
  0xa6   :  { %v368_v34 = vpop.f32.mrf.mxu2  ;;  %v222_v38 = vpop.f32.mrf.mxu0 }
  0xa7   :  { %v1316_v36 = vadd.f32 %v368_v34, %v268_v30  ;;  %v269_v39 = vpop.f32.mrf.mxu1 }
  0xa8   :  { %v270_v46 = vadd.f32 %v269_v39, %v222_v38  ;;  %v1037_v38 = vld [vmem:[%s1486_s2] sm:$0xff] }
  0xa9   :  { %v392_v42 = vmul.f32 %v1316_v36, %v1316_v36  ;;  %v380_v45 = vsel %vm199_vm1, %v1316_v36, 0.0 }
  0xaa   :  { %v381_v54 = vadd.f32 %v380_v45, %v379_v47 }
  0xab   :  { %v397_v50 = vsel %vm199_vm1, %v392_v42, 0.0 }
  0xac   :  { %v398_v58 = vadd.f32 %v397_v50, %v396_v53 }
  0xae   :  { %v370_v48 = vpop.f32.mrf.mxu2 }
  0xaf   :  { %v1334_v52 = vadd.f32 %v370_v48, %v270_v46 }
  0xb1   :  { %v382_v56 = vsel %vm199_vm1, %v1334_v52, 0.0  ;;  %v393_v57 = vmul.f32 %v1334_v52, %v1334_v52 }
  0xb2   :  { %v383_v59 = vadd.f32 %v382_v56, %v381_v54  ;;  %v1047_v54 = vld [vmem:[%s1484_s4] ss:$0 sm:$0xff] }
  0xb3   :  { %v399_v60 = vsel %vm199_vm1, %v393_v57, 0.0 }
  0xb4   :  { %v384_v61 = vrot.slane %v383_v59, 4  ;;  %v400_v62 = vadd.f32 %v399_v60, %v398_v58 }
  0xb6   :  { %v401_v63 = vrot.slane %v400_v62, 4  ;;  %v385_v0 = vadd.f32 %v384_v61, %v383_v59 }
  0xb8   :  { %v402_v1 = vadd.f32 %v401_v63, %v400_v62  ;;  %v386_v2 = vrot.slane %v385_v0, 2 }
  0xba   :  { %v387_v4 = vadd.f32 %v386_v2, %v385_v0  ;;  %v403_v6 = vrot.slane %v402_v1, 2 }
  0xbc   :  { %v388_v8 = vrot.slane %v387_v4, 1  ;;  %v404_v13 = vadd.f32 %v403_v6, %v402_v1 }
  0xbe   :  { %v389_v9 = vadd.f32 %v388_v8, %v387_v4  ;;  %v405_v14 = vrot.slane %v404_v13, 1 }
  0xc0   :  { %946 = vmatmul.msk.f32.vlgmr.msra.gmra.mxu3 %vm199_vm1, %v389_v9  ;;  %v406_v21 = vadd.f32 %v405_v14, %v404_v13 }
  0xc1   :  { %768 = vmatpush.msra.mxu3 %v1260_v10 }
  0xc3   :  { %769 = vmatpush.msra.mxu3 %v1266_v11 }
  0xc5   :  { %770 = vmatpush.msra.mxu3 %v1272_v12 }
  0xc7   :  { %771 = vmatpush.msra.mxu3 %v1278_v17 }
  0xc8   :  { %947 = vmatmul.msk.f32.vlgmr.msrb.gmra.mxu3 %vm199_vm1, %v406_v21 }
  0xc9   :  { %772 = vmatpush.msra.mxu3 %v1284_v18 }
  0xcb   :  { %773 = vmatpush.msra.mxu3 %v1290_v19 }
  0xcd   :  { %774 = vmatpush.msra.mxu3 %v1296_v20 }
  0xcf   :  { %775 = vmatpush.msra.mxu3 %v1302_v24 }
  0xd1   :  { %792 = vmatpush.msrb.mxu3 %v1260_v10  ;;  %v1044_v10 = vld [vmem:[%s1486_s2 + $0x58] sm:$0xff] }
  0xd2   :  { %708 = vmatpush.bf16.msrb.mxu2 %v1044_v10 }
  0xd3   :  { %793 = vmatpush.msrb.mxu3 %v1266_v11  ;;  %v1040_v11 = vld [vmem:[%s1486_s2 + $0x18] sm:$0xff] }
  0xd4   :  { %591 = vmatpush.bf16.msrb.mxu0 %v1040_v11 }
  0xd5   :  { %794 = vmatpush.msrb.mxu3 %v1272_v12  ;;  %v1035_v12 = vld [vmem:[%s1486_s2 + $0x30] sm:$0xff] }
  0xd6   :  { %639 = vmatpush.bf16.msrb.mxu1 %v1035_v12 }
  0xd7   :  { %795 = vmatpush.msrb.mxu3 %v1278_v17 }
  0xd9   :  { %796 = vmatpush.msrb.mxu3 %v1284_v18  ;;  %v1043_v18 = vld [vmem:[%s1486_s2 + $0x50] sm:$0xff] }
  0xda   :  { %709 = vmatpush.bf16.msrb.mxu2 %v1043_v18 }
  0xdb   :  { %797 = vmatpush.msrb.mxu3 %v1290_v19  ;;  %v1039_v19 = vld [vmem:[%s1486_s2 + $0x10] sm:$0xff] }
  0xdc   :  { %592 = vmatpush.bf16.msrb.mxu0 %v1039_v19 }
  0xdd   :  { %798 = vmatpush.msrb.mxu3 %v1296_v20  ;;  %v1034_v20 = vld [vmem:[%s1486_s2 + $0x28] sm:$0xff] }
  0xde   :  { %640 = vmatpush.bf16.msrb.mxu1 %v1034_v20  ;;  %710 = vmatpush.bf16.msrb.mxu2 %v1042_v27 }
  0xdf   :  { %799 = vmatpush.msrb.mxu3 %v1302_v24 }
  0xe0   :  { %593 = vmatpush.bf16.msrb.mxu0 %v1038_v28 }
  0xe2   :  { %641 = vmatpush.bf16.msrb.mxu1 %v1033_v29  ;;  %711 = vmatpush.bf16.msrb.mxu2 %v1041_v37 }
  0xe4   :  { %594 = vmatpush.bf16.msrb.mxu0 %v1037_v38 }
 0x143   :  { %v435_v22 = vpop.f32.mrf.mxu3 }
 0x144   :  { %v438_v17 = vmul.f32 0.001953125, %v435_v22 }
 0x146   :  { %v463_v25 = vmul.f32 %v438_v17, %v438_v17  ;;  %v465_v43 = vperm.slane %v438_v17, 0 }
 0x148   :  { %v466_v46 = vsub.f32 %v1314_v35, %v465_v43  ;;  %v467_v48 = vsub.f32 %v1311_v31, %v465_v43  ;;  %v468_v49 = vsub.f32 %v1316_v36, %v465_v43  ;;  %v469_v50 = vsub.f32 %v1334_v52, %v465_v43  ;;  %v1048_v35 = vld [vmem:[%s1485_s5] ss:$0 sm:$0xff] }
 0x14b   :  { %v459_v24 = vpop.f32.mrf.mxu3 }
 0x14c   :  { %v462_v26 = vmul.f32 0.001953125, %v459_v24 }
 0x14e   :  { %v464_v30 = vsub.f32 %v462_v26, %v463_v25 }
 0x150   :  { %v470_v34 = vadd.f32 1e-05, %v464_v30 }
 0x152   :  { %1051 = vrsqrt.f32 %v470_v34  ;;  %vm477_vm14 = vweird.f32 %v470_v34 }
 0x158   :  { %v1052_v39 = vpop.eup %1051 }
 0x159   :  { %v472_v40 = vmul.f32 %v1052_v39, %v470_v34  ;;  %vm478_vm13 = vweird.f32 %v1052_v39 }
 0x15a   :  { %vm479_vm4 = vmor %vm477_vm14, %vm478_vm13 }
 0x15b   :  { %v473_v41 = vmul.f32 %v1052_v39, %v472_v40 }
 0x15d   :  { %v474_v42 = vmul.f32 0.5, %v473_v41 }
 0x15f   :  { %v475_v44 = vsub.f32 1.5, %v474_v42 }
 0x161   :  { %v476_v45 = vmul.f32 %v1052_v39, %v475_v44 }
 0x163   :  { %v480_v47 = vsel %vm479_vm4, %v1052_v39, %v476_v45 }
 0x164   :  { %v481_v53 = vperm.slane %v480_v47, 0 }
 0x166   :  { %v484_v56 = vmul.f32 %v481_v53, %v468_v49  ;;  %v485_v57 = vmul.f32 %v481_v53, %v469_v50  ;;  %v482_v58 = vmul.f32 %v481_v53, %v466_v46  ;;  %v483_v59 = vmul.f32 %v481_v53, %v467_v48 }
 0x168   :  { %v490_v60 = vmul.f32 %v1047_v54, %v482_v58  ;;  %v491_v61 = vmul.f32 %v1047_v54, %v483_v59  ;;  %v492_v31 = vmul.f32 %v1047_v54, %v484_v56  ;;  %v493_v62 = vmul.f32 %v1047_v54, %v485_v57 }
 0x16a   :  { %v498_v36 = vadd.f32 %v1048_v35, %v490_v60  ;;  %v499_v63 = vadd.f32 %v1048_v35, %v491_v61  ;;  %v500_v52 = vadd.f32 %v1048_v35, %v492_v31  ;;  %v501_v0 = vadd.f32 %v1048_v35, %v493_v62 }
 0x16c   :  { %v502_v1 = vmax.f32 %v498_v36, 0.0  ;;  %v503_v2 = vmax.f32 %v499_v63, 0.0  ;;  %v504_v4 = vmax.f32 %v500_v52, 0.0  ;;  %v505_v6 = vmax.f32 %v501_v0, 0.0 }
 0x16e   :  { %v506_v8 = vpack.c.bf16 %v502_v1, %v502_v1  ;;  %v507_v9 = vpack.c.bf16 %v503_v2, %v503_v2  ;;  %v508_v13 = vpack.c.bf16 %v504_v4, %v504_v4  ;;  %v509_v14 = vpack.c.bf16 %v505_v6, %v505_v6 }
 0x170   :  { %v523_v21 = vunpack.c.l.b16 %v506_v8  ;;  %v524_v22 = vunpack.c.l.b16 %v507_v9  ;;  %v525_v23 = vunpack.c.l.b16 %v508_v13  ;;  %v526_v10 = vunpack.c.l.b16 %v509_v14 }
 0x172   :  { %v527_v11 = vpack.c.b16 %v524_v22, %v523_v21  ;;  %v528_v12 = vpack.c.b16 %v526_v10, %v525_v23  ;;  %v660_v33 = vpack.c.b16 %v526_v10, %v526_v10 }
 0x174   :  { %v530_v17 = vshrl.u32 %v527_v11, 16  ;;  %990 = vmatmul.msk.bf16.vlgmr.msrb.gmra.mxu1 %vm199_vm1, %v527_v11  ;;  %v533_v18 = vshll.u32 %v527_v11, 16  ;;  %v540_v19 = vshll.u32 %v528_v12, 16  ;;  %v537_v37 = vshrl.u32 %v528_v12, 16 }
 0x176   :  { %v532_v20 = vrot.slane %v530_v17, 7  ;;  %v653_v24 = vrot.slane %v533_v18, 1  ;;  %v655_v27 = vrot.slane %v540_v19, 1  ;;  %v539_v38 = vrot.slane %v537_v37, 7 }
 0x178   :  { %v535_v25 = vor.u32 %v533_v18, %v532_v20  ;;  %v654_v26 = vor.u32 %v653_v24, %v530_v17  ;;  %v542_v39 = vor.u32 %v540_v19, %v539_v38  ;;  %v657_v40 = vor.u32 %v655_v27, %v537_v37 }
 0x17a   :  { %v546_v28 = vsel %vm1177_vm8, %v506_v8, %v535_v25  ;;  %v656_v29 = vsel %vm272_vm9, %v654_v26, %v655_v27  ;;  %v543_v41 = vsel %vm116_vm0, %v532_v20, %v542_v39  ;;  %v662_v51 = vsel %vm1228_vm10, %v657_v40, %v660_v33 }
 0x17b   :  { %v547_v30 = vsel %vm1202_vm15, %v546_v28, 0  ;;  %v663_v34 = vsel %vm1212_vm3, %v656_v29, 0  ;;  %v548_v55 = vsel %vm1237_vm12, %v543_v41, 0  ;;  %v664_v42 = vsel %vm1245_vm2, %v662_v51, 0 }
 0x17c   :  { %972 = vmatmul.msk.bf16.vlgmr.msrb.gmra.mxu0 %vm199_vm1, %v547_v30  ;;  %1016 = vmatmul.msk.bf16.vlgmr.msrb.gmra.mxu2 %vm199_vm1, %v663_v34 }
 0x184   :  { %991 = vmatmul.msk.bf16.gmra.mxu1 %vm199_vm1, %v528_v12 }
 0x18c   :  { %973 = vmatmul.msk.bf16.gmra.mxu0 %vm199_vm1, %v548_v55  ;;  %1017 = vmatmul.msk.bf16.gmra.mxu2 %vm199_vm1, %v664_v42 }
 0x1f1   :  { %v643_v43 = vpop.f32.mrf.mxu1 }
 0x1f9   :  { %v596_v44 = vpop.f32.mrf.mxu0  ;;  %v645_v46 = vpop.f32.mrf.mxu1 }
 0x1fa   :  { %v644_v53 = vadd.f32 %v643_v43, %v596_v44 }
 0x1ff   :  { %v713_v45 = vpop.f32.mrf.mxu2 }
 0x200   :  { %v1427_v7 = vadd.f32 %v713_v45, %v644_v53 }
 0x201   :  { %v598_v47 = vpop.f32.mrf.mxu0  ;;  %v648_v50 = vpop.f32.mrf.mxu1 }
 0x202   :  { %v646_v3 = vadd.f32 %v645_v46, %v598_v47  ;;  %v740_v35 = vmul.f32 %v1427_v7, %v1427_v7  ;;  %v727_v62 = vsel %vm199_vm1, %v1427_v7, 0.0 }
 0x204   :  { %v744_v2 = vsel %vm199_vm1, %v740_v35, 0.0 }
 0x207   :  { %v715_v48 = vpop.f32.mrf.mxu2 }
 0x208   :  { %v1425_v54 = vadd.f32 %v715_v48, %v646_v3  ;;  %v33_v48 = vld [vmem:[%s1482_s0 + $0x4] sm:$0xf] }
 0x209   :  { %v601_v49 = vpop.f32.mrf.mxu0  ;;  %v650_v31 = vpop.f32.mrf.mxu1 }
 0x20a   :  { %v649_v5 = vadd.f32 %v648_v50, %v601_v49  ;;  %v741_v58 = vmul.f32 %v1425_v54, %v1425_v54  ;;  %v728_v60 = vsel %vm199_vm1, %v1425_v54, 0.0 }
 0x20b   :  { %v729_v0 = vadd.f32 %v728_v60, %v727_v62  ;;  %v844_v60 = vunpack.c.l.bf16 %v1173_v32 }
 0x20c   :  { %v745_v36 = vsel %vm199_vm1, %v741_v58, 0.0 }
 0x20d   :  { %v746_v8 = vadd.f32 %v745_v36, %v744_v2 }
 0x20f   :  { %v718_v56 = vpop.f32.mrf.mxu2 }
 0x210   :  { %v1429_v57 = vadd.f32 %v718_v56, %v649_v5  ;;  %v1049_v5 = vld [vmem:[%s1487_s6] ss:$0 sm:$0xff] }
 0x211   :  { %v603_v59 = vpop.f32.mrf.mxu0 }
 0x212   :  { %v742_v61 = vmul.f32 %v1429_v57, %v1429_v57  ;;  %v730_v63 = vsel %vm199_vm1, %v1429_v57, 0.0  ;;  %v651_v52 = vadd.f32 %v650_v31, %v603_v59 }
 0x213   :  { %v731_v9 = vadd.f32 %v730_v63, %v729_v0 }
 0x214   :  { %v747_v4 = vsel %vm199_vm1, %v742_v61, 0.0  ;;  %v845_v61 = vunpack.c.l.bf16 %v33_v48 }
 0x215   :  { %v748_v21 = vadd.f32 %v747_v4, %v746_v8 }
 0x217   :  { %v720_v1 = vpop.f32.mrf.mxu2 }
 0x218   :  { %v726_v6 = vadd.f32 %v720_v1, %v651_v52 }
 0x21a   :  { %v732_v13 = vsel %vm199_vm1, %v726_v6, 0.0  ;;  %v743_v14 = vmul.f32 %v726_v6, %v726_v6 }
 0x21b   :  { %v733_v22 = vadd.f32 %v732_v13, %v731_v9 }
 0x21c   :  { %v749_v23 = vsel %vm199_vm1, %v743_v14, 0.0 }
 0x21d   :  { %v734_v10 = vrot.slane %v733_v22, 4  ;;  %v750_v11 = vadd.f32 %v749_v23, %v748_v21 }
 0x21f   :  { %v735_v12 = vadd.f32 %v734_v10, %v733_v22  ;;  %v751_v17 = vrot.slane %v750_v11, 4 }
 0x221   :  { %v736_v18 = vrot.slane %v735_v12, 2  ;;  %v752_v19 = vadd.f32 %v751_v17, %v750_v11 }
 0x223   :  { %v737_v20 = vadd.f32 %v736_v18, %v735_v12  ;;  %v753_v24 = vrot.slane %v752_v19, 2 }
 0x225   :  { %v738_v25 = vrot.slane %v737_v20, 1  ;;  %v754_v26 = vadd.f32 %v753_v24, %v752_v19 }
 0x227   :  { %v739_v27 = vadd.f32 %v738_v25, %v737_v20  ;;  %v755_v28 = vrot.slane %v754_v26, 1 }
 0x229   :  { %1018 = vmatmul.msk.f32.vlgmr.msra.gmra.mxu3 %vm199_vm1, %v739_v27  ;;  %v756_v29 = vadd.f32 %v755_v28, %v754_v26 }
 0x231   :  { %1019 = vmatmul.msk.f32.vlgmr.msrb.gmra.mxu3 %vm199_vm1, %v756_v29 }
 0x2ac   :  { %v777_v30 = vpop.f32.mrf.mxu3 }
 0x2ad   :  { %v780_v34 = vmul.f32 0.001953125, %v777_v30 }
 0x2af   :  { %v805_v38 = vmul.f32 %v780_v34, %v780_v34  ;;  %v807_v43 = vperm.slane %v780_v34, 0 }
 0x2b1   :  { %v808_v46 = vsub.f32 %v1427_v7, %v807_v43  ;;  %v809_v49 = vsub.f32 %v1425_v54, %v807_v43  ;;  %v810_v50 = vsub.f32 %v1429_v57, %v807_v43  ;;  %v811_v3 = vsub.f32 %v726_v6, %v807_v43  ;;  %v1050_v7 = vld [vmem:[%s1488_s7] ss:$0 sm:$0xff] }
 0x2b2   :  { %v846_v54 = vunpack.c.l.bf16 %v1135_v15  ;;  %v847_v57 = vunpack.c.l.bf16 %v1140_v16 }
 0x2b4   :  { %v801_v37 = vpop.f32.mrf.mxu3 }
 0x2b5   :  { %v804_v39 = vmul.f32 0.001953125, %v801_v37 }
 0x2b7   :  { %v806_v40 = vsub.f32 %v804_v39, %v805_v38 }
 0x2b9   :  { %v812_v33 = vadd.f32 1e-05, %v806_v40 }
 0x2bb   :  { %1053 = vrsqrt.f32 %v812_v33  ;;  %vm819_vm8 = vweird.f32 %v812_v33 }
 0x2c1   :  { %v1054_v41 = vpop.eup %1053 }
 0x2c2   :  { %v814_v51 = vmul.f32 %v1054_v41, %v812_v33  ;;  %vm820_vm0 = vweird.f32 %v1054_v41 }
 0x2c3   :  { %vm821_vm9 = vmor %vm819_vm8, %vm820_vm0 }
 0x2c4   :  { %v815_v55 = vmul.f32 %v1054_v41, %v814_v51 }
 0x2c6   :  { %v816_v42 = vmul.f32 0.5, %v815_v55 }
 0x2c8   :  { %v817_v44 = vsub.f32 1.5, %v816_v42 }
 0x2ca   :  { %v818_v45 = vmul.f32 %v1054_v41, %v817_v44 }
 0x2cc   :  { %v822_v47 = vsel %vm821_vm9, %v1054_v41, %v818_v45 }
 0x2cd   :  { %v823_v53 = vperm.slane %v822_v47, 0 }
 0x2cf   :  { %v824_v56 = vmul.f32 %v823_v53, %v808_v46  ;;  %v825_v58 = vmul.f32 %v823_v53, %v809_v49  ;;  %v826_v59 = vmul.f32 %v823_v53, %v810_v50  ;;  %v827_v35 = vmul.f32 %v823_v53, %v811_v3 }
 0x2d1   :  { %v832_v31 = vmul.f32 %v1049_v5, %v824_v56  ;;  %v833_v62 = vmul.f32 %v1049_v5, %v825_v58  ;;  %v834_v36 = vmul.f32 %v1049_v5, %v826_v59  ;;  %v835_v63 = vmul.f32 %v1049_v5, %v827_v35 }
 0x2d3   :  { %v840_v52 = vadd.f32 %v1050_v7, %v832_v31  ;;  %v841_v0 = vadd.f32 %v1050_v7, %v833_v62  ;;  %v842_v1 = vadd.f32 %v1050_v7, %v834_v36  ;;  %v843_v2 = vadd.f32 %v1050_v7, %v835_v63 }
 0x2d5   :  { %v848_v4 = vadd.f32 %v844_v60, %v840_v52  ;;  %v849_v6 = vadd.f32 %v845_v61, %v841_v0  ;;  %v850_v8 = vadd.f32 %v846_v54, %v842_v1  ;;  %v851_v9 = vadd.f32 %v847_v57, %v843_v2 }
 0x2d7   :  { %v852_v13 = vmax.f32 %v848_v4, 0.0  ;;  %v853_v14 = vmax.f32 %v849_v6, 0.0  ;;  %v854_v32 = vmax.f32 %v850_v8, 0.0  ;;  %v855_v21 = vmax.f32 %v851_v9, 0.0 }
 0x2d9   :  { %856 = vst.msk [vmem:[%s1489_s8] sm:$0xff] %vm199_vm1, %v852_v13 }
 0x2da   :  { %857 = vst.msk [vmem:[%s1489_s8 + $0x8] sm:$0xff] %vm199_vm1, %v853_v14 }
 0x2db   :  { %858 = vst.msk [vmem:[%s1489_s8 + $0x10] sm:$0xff] %vm199_vm1, %v854_v32 }
 0x2dc   :  { %859 = vst.msk [vmem:[%s1489_s8 + $0x18] sm:$0xff] %vm199_vm1, %v855_v21 }

</bundles_post_ra>
